<compile_context>
chip_gen: v7x
topology: tpu7x:2x2x1
jax: 0.10.0
libtpu: 0.0.40
codegen_flags: <defaults>
</compile_context>

<pallas_src>
import jax
import jax.numpy as jnp
from jax.experimental import pallas as pl
from jax.experimental.pallas import tpu as pltpu


def _sae_kernel(x_ref,
                w1_ref, b1_ref,
                w2_ref, b2_ref,
                w3_ref, b3_ref,
                w4_ref, b4_ref,
                out_ref):
    """One batch tile: fc1 -> sigmoid -> fc2 -> sigmoid -> fc3 -> sigmoid -> fc4.

    Operates directly on the lane-dense packed layout; the weights are
    block-diagonal and the biases lane-tiled, so no in-kernel relayout occurs.
    """
    x0 = x_ref[...]
    h1 = jax.nn.sigmoid(
        jnp.dot(x0, w1_ref[...], preferred_element_type=jnp.float32) + b1_ref[...])
    h2 = jax.nn.sigmoid(
        jnp.dot(h1, w2_ref[...], preferred_element_type=jnp.float32) + b2_ref[...])
    h3 = jax.nn.sigmoid(
        jnp.dot(h2, w3_ref[...], preferred_element_type=jnp.float32) + b3_ref[...])
    h4 = jnp.dot(h3, w4_ref[...], preferred_element_type=jnp.float32) + b4_ref[...]
    out_ref[...] = h4.astype(out_ref.dtype)


def _round_up(n, m):
    return ((n + m - 1) // m) * m


def _block_diag(w, pack):
    """blockdiag(w, ..., w) with `pack` copies; identity when pack == 1."""
    if pack == 1:
        return w
    return jnp.kron(jnp.eye(pack, dtype=w.dtype), w)


def sae_forward(x, params, target_block_bytes=4 << 20, vmem_limit_bytes=48 << 20):
    """Run the SAE forward pass with a batch-tiled Pallas call.

    x:      (B, nb_labels) float32
    params: dict with w1..w4 stored as (fan_in, fan_out) and b1..b4 as (1, fan_out).
    """
    B, nb_labels = x.shape
    in_f = params["w1"].shape[1]
    out_f = params["w2"].shape[1]

    # Lane-dense pack factor so streamed tiles fill all 128 lanes.
    if nb_labels < 128 and 128 % nb_labels == 0:
        pack = 128 // nb_labels
    else:
        pack = 1  # fallback: masked lanes (perf cliff, still correct)
    lane = nb_labels * pack

    # Pad only to the pack factor (<= pack-1 rows, only when needed).  The
    # ragged last grid block is handled by Pallas' boundary masking, so no
    # pad-to-tile full-array HBM copy is required.
    b_pack = _round_up(B, pack)
    x_p = x if b_pack == B else jnp.pad(x, ((0, b_pack - B), (0, 0)))
    rows_total = b_pack // pack
    # Row-major (b_pack, nb_labels) -> (rows_total, lane): free bitcast reshape.
    x_packed = x_p.reshape(rows_total, lane)

    # Tile sizing: target ~target_block_bytes per streamed block (amortizes the
    # ~0.35us per-step overhead and sits at HBM roofline), keep double-buffered
    # in+out (~4x block) inside vmem_limit_bytes, keep >= 2 grid steps when the
    # batch allows it (v7x megacore), and keep the sublane dim 8-aligned.
    bytes_per_row = lane * x_packed.dtype.itemsize
    rows_per_tile = max(8, target_block_bytes // bytes_per_row)
    rows_per_tile = min(rows_per_tile,
                        max(8, (vmem_limit_bytes // 4) // bytes_per_row))
    rows_per_tile = _round_up(rows_per_tile, 8)
    if rows_total > 8:
        rows_per_tile = min(rows_per_tile, _round_up(pl.cdiv(rows_total, 2), 8))
    if rows_per_tile > rows_total:
        rows_per_tile = rows_total  # single block == full extent (legal block dim)
    grid = (pl.cdiv(rows_total, rows_per_tile),)

    # Block-diagonal weights / lane-tiled biases: compute on the packed layout.
    w1 = _block_diag(params["w1"], pack)
    w2 = _block_diag(params["w2"], pack)
    w3 = _block_diag(params["w3"], pack)
    w4 = _block_diag(params["w4"], pack)
    b1 = jnp.tile(params["b1"], (1, pack))
    b2 = jnp.tile(params["b2"], (1, pack))
    b3 = jnp.tile(params["b3"], (1, pack))
    b4 = jnp.tile(params["b4"], (1, pack))

    def resident(arr):
        # Full-array block at a constant index -> fetched once, VMEM-resident.
        return pl.BlockSpec(arr.shape, lambda i: (0, 0))

    args = (x_packed, w1, b1, w2, b2, w3, b3, w4, b4)
    in_specs = [pl.BlockSpec((rows_per_tile, lane), lambda i: (i, 0))]
    in_specs += [resident(a) for a in args[1:]]

    # Advisory cost estimate (logical flops; the block-diag zeros are free-ish).
    flops = 2 * B * (nb_labels * in_f + in_f * out_f + out_f * in_f + in_f * nb_labels)
    transcendentals = B * (in_f + out_f + in_f)
    bytes_accessed = (2 * B * nb_labels + sum(int(a.size) for a in args[1:])) * 4

    out_packed = pl.pallas_call(
        _sae_kernel,
        out_shape=jax.ShapeDtypeStruct((rows_total, lane), x.dtype),
        grid_spec=pltpu.PrefetchScalarGridSpec(
            num_scalar_prefetch=0,
            grid=grid,
            in_specs=in_specs,
            out_specs=pl.BlockSpec((rows_per_tile, lane), lambda i: (i, 0)),
        ),
        compiler_params=pltpu.CompilerParams(
            dimension_semantics=("parallel",),  # batch tiles are independent
            vmem_limit_bytes=vmem_limit_bytes,
        ),
        cost_estimate=pl.CostEstimate(
            flops=int(flops),
            transcendentals=int(transcendentals),
            bytes_accessed=int(bytes_accessed),
        ),
    )(*args)

    out = out_packed.reshape(b_pack, nb_labels)
    return out[:B]


def init_sae_params(key, nb_labels, in_f=20, out_f=10):
    """nn.Linear-style init: U(-1/sqrt(fan_in), 1/sqrt(fan_in)).

    Weights stored pre-transposed as (fan_in, fan_out); biases as (1, fan_out).
    """
    dims = [(nb_labels, in_f), (in_f, out_f), (out_f, in_f), (in_f, nb_labels)]
    params = {}
    for idx, (fan_in, fan_out) in enumerate(dims, start=1):
        key, kw, kb = jax.random.split(key, 3)
        bound = 1.0 / jnp.sqrt(jnp.float32(fan_in))
        params[f"w{idx}"] = jax.random.uniform(
            kw, (fan_in, fan_out), jnp.float32, minval=-bound, maxval=bound)
        params[f"b{idx}"] = jax.random.uniform(
            kb, (1, fan_out), jnp.float32, minval=-bound, maxval=bound)
    return params


def sae_reference(x, params):
    """Pure-JAX reference for correctness checking."""
    x1 = jax.nn.sigmoid(x @ params["w1"] + params["b1"])
    x2 = jax.nn.sigmoid(x1 @ params["w2"] + params["b2"])
    x3 = jax.nn.sigmoid(x2 @ params["w3"] + params["b3"])
    return x3 @ params["w4"] + params["b4"]


if __name__ == "__main__":
    nb_labels = 32   # total number of labels (first / last layer width)
    in_f = 20
    out_f = 10
    batch = 8

    key = jax.random.PRNGKey(0)
    key, kx = jax.random.split(key)
    x = jax.random.normal(kx, (batch, nb_labels), jnp.float32)
    params = init_sae_params(key, nb_labels, in_f, out_f)

    # Small single-block case.
    out = jax.block_until_ready(sae_forward(x, params))
    ref = sae_reference(x, params)
    assert out.shape == (batch, nb_labels)
    assert jnp.allclose(out, ref, atol=1e-5, rtol=1e-5), "mismatch vs reference (small)"

    # Multi-step grid with a ragged last block (no pack padding: 100 % 4 == 0).
    key, kx2 = jax.random.split(key)
    x2 = jax.random.normal(kx2, (100, nb_labels), jnp.float32)
    out2 = jax.block_until_ready(sae_forward(x2, params))
    ref2 = sae_reference(x2, params)
    assert out2.shape == (100, nb_labels)
    assert jnp.allclose(out2, ref2, atol=1e-5, rtol=1e-5), "mismatch vs reference (grid)"

    # Batch not a multiple of the pack factor (exercises the tiny pack pad +
    # ragged last block + output slicing).
    key, kx3 = jax.random.split(key)
    x3 = jax.random.normal(kx3, (50, nb_labels), jnp.float32)
    out3 = jax.block_until_ready(sae_forward(x3, params))
    ref3 = sae_reference(x3, params)
    assert out3.shape == (50, nb_labels)
    assert jnp.allclose(out3, ref3, atol=1e-5, rtol=1e-5), "mismatch vs reference (ragged)"

    print("KERNEL_OK")
</pallas_src>

<mosaic_0001>
module attributes {stable_mosaic.version = 11 : i64} {
  func.func @_sae_kernel(%arg0: i32, %arg1: memref<2x128xf32, #tpu.memory_space<vmem>>, %arg2: memref<128x80xf32, #tpu.memory_space<vmem>>, %arg3: memref<1x80xf32, #tpu.memory_space<vmem>>, %arg4: memref<80x40xf32, #tpu.memory_space<vmem>>, %arg5: memref<1x40xf32, #tpu.memory_space<vmem>>, %arg6: memref<40x80xf32, #tpu.memory_space<vmem>>, %arg7: memref<1x80xf32, #tpu.memory_space<vmem>>, %arg8: memref<80x128xf32, #tpu.memory_space<vmem>>, %arg9: memref<1x128xf32, #tpu.memory_space<vmem>>, %arg10: memref<2x128xf32, #tpu.memory_space<vmem>>) attributes {dimension_semantics = [#tpu.dimension_semantics<parallel>], iteration_bounds = array<i64: 1>, scalar_prefetch = 0 : i64, scratch_operands = 0 : i64, tpu.core_type = #tpu.core_type<tc>, window_params = [{transform_indices = @transform_0, window_bounds = array<i64: 2, 128>}, {pipeline_mode = #tpu.pipeline_mode<synchronous>, transform_indices = @transform_1, window_bounds = array<i64: 128, 80>}, {pipeline_mode = #tpu.pipeline_mode<synchronous>, transform_indices = @transform_2, window_bounds = array<i64: 1, 80>}, {pipeline_mode = #tpu.pipeline_mode<synchronous>, transform_indices = @transform_3, window_bounds = array<i64: 80, 40>}, {pipeline_mode = #tpu.pipeline_mode<synchronous>, transform_indices = @transform_4, window_bounds = array<i64: 1, 40>}, {pipeline_mode = #tpu.pipeline_mode<synchronous>, transform_indices = @transform_5, window_bounds = array<i64: 40, 80>}, {pipeline_mode = #tpu.pipeline_mode<synchronous>, transform_indices = @transform_6, window_bounds = array<i64: 1, 80>}, {pipeline_mode = #tpu.pipeline_mode<synchronous>, transform_indices = @transform_7, window_bounds = array<i64: 80, 128>}, {pipeline_mode = #tpu.pipeline_mode<synchronous>, transform_indices = @transform_8, window_bounds = array<i64: 1, 128>}, {transform_indices = @transform_9, window_bounds = array<i64: 2, 128>}]} {
    %c0 = arith.constant 0 : index
    %c0_0 = arith.constant 0 : index
    %0 = vector.load %arg1[%c0, %c0_0] : memref<2x128xf32, #tpu.memory_space<vmem>>, vector<2x128xf32>
    %c0_1 = arith.constant 0 : index
    %c0_2 = arith.constant 0 : index
    %1 = vector.load %arg2[%c0_1, %c0_2] : memref<128x80xf32, #tpu.memory_space<vmem>>, vector<128x80xf32>
    %cst = arith.constant dense<0.000000e+00> : vector<2x80xf32>
    %2 = tpu.matmul %0, %1, %cst {dimension_numbers = #tpu.dot_dimension_numbers<[1], [0], [0], [1], [0, 0, 1, 1], [], []>} : vector<2x128xf32>, vector<128x80xf32>, vector<2x80xf32> -> vector<2x80xf32>
    %c0_3 = arith.constant 0 : index
    %c0_4 = arith.constant 0 : index
    %3 = vector.load %arg3[%c0_3, %c0_4] : memref<1x80xf32, #tpu.memory_space<vmem>>, vector<1x80xf32>
    %4 = vector.broadcast %3 : vector<1x80xf32> to vector<2x80xf32>
    %5 = arith.addf %2, %4 : vector<2x80xf32>
    %6 = arith.negf %5 : vector<2x80xf32>
    %7 = math.exp %6 : vector<2x80xf32>
    %cst_5 = arith.constant 1.000000e+00 : f32
    %8 = vector.broadcast %cst_5 : f32 to vector<2x80xf32>
    %9 = arith.addf %8, %7 : vector<2x80xf32>
    %10 = arith.divf %8, %9 : vector<2x80xf32>
    %c0_6 = arith.constant 0 : index
    %c0_7 = arith.constant 0 : index
    %11 = vector.load %arg4[%c0_6, %c0_7] : memref<80x40xf32, #tpu.memory_space<vmem>>, vector<80x40xf32>
    %cst_8 = arith.constant dense<0.000000e+00> : vector<2x40xf32>
    %12 = tpu.matmul %10, %11, %cst_8 {dimension_numbers = #tpu.dot_dimension_numbers<[1], [0], [0], [1], [0, 0, 1, 1], [], []>} : vector<2x80xf32>, vector<80x40xf32>, vector<2x40xf32> -> vector<2x40xf32>
    %c0_9 = arith.constant 0 : index
    %c0_10 = arith.constant 0 : index
    %13 = vector.load %arg5[%c0_9, %c0_10] : memref<1x40xf32, #tpu.memory_space<vmem>>, vector<1x40xf32>
    %14 = vector.broadcast %13 : vector<1x40xf32> to vector<2x40xf32>
    %15 = arith.addf %12, %14 : vector<2x40xf32>
    %16 = arith.negf %15 : vector<2x40xf32>
    %17 = math.exp %16 : vector<2x40xf32>
    %cst_11 = arith.constant 1.000000e+00 : f32
    %18 = vector.broadcast %cst_11 : f32 to vector<2x40xf32>
    %19 = arith.addf %18, %17 : vector<2x40xf32>
    %20 = arith.divf %18, %19 : vector<2x40xf32>
    %c0_12 = arith.constant 0 : index
    %c0_13 = arith.constant 0 : index
    %21 = vector.load %arg6[%c0_12, %c0_13] : memref<40x80xf32, #tpu.memory_space<vmem>>, vector<40x80xf32>
    %cst_14 = arith.constant dense<0.000000e+00> : vector<2x80xf32>
    %22 = tpu.matmul %20, %21, %cst_14 {dimension_numbers = #tpu.dot_dimension_numbers<[1], [0], [0], [1], [0, 0, 1, 1], [], []>} : vector<2x40xf32>, vector<40x80xf32>, vector<2x80xf32> -> vector<2x80xf32>
    %c0_15 = arith.constant 0 : index
    %c0_16 = arith.constant 0 : index
    %23 = vector.load %arg7[%c0_15, %c0_16] : memref<1x80xf32, #tpu.memory_space<vmem>>, vector<1x80xf32>
    %24 = vector.broadcast %23 : vector<1x80xf32> to vector<2x80xf32>
    %25 = arith.addf %22, %24 : vector<2x80xf32>
    %26 = arith.negf %25 : vector<2x80xf32>
    %27 = math.exp %26 : vector<2x80xf32>
    %cst_17 = arith.constant 1.000000e+00 : f32
    %28 = vector.broadcast %cst_17 : f32 to vector<2x80xf32>
    %29 = arith.addf %28, %27 : vector<2x80xf32>
    %30 = arith.divf %28, %29 : vector<2x80xf32>
    %c0_18 = arith.constant 0 : index
    %c0_19 = arith.constant 0 : index
    %31 = vector.load %arg8[%c0_18, %c0_19] : memref<80x128xf32, #tpu.memory_space<vmem>>, vector<80x128xf32>
    %cst_20 = arith.constant dense<0.000000e+00> : vector<2x128xf32>
    %32 = tpu.matmul %30, %31, %cst_20 {dimension_numbers = #tpu.dot_dimension_numbers<[1], [0], [0], [1], [0, 0, 1, 1], [], []>} : vector<2x80xf32>, vector<80x128xf32>, vector<2x128xf32> -> vector<2x128xf32>
    %c0_21 = arith.constant 0 : index
    %c0_22 = arith.constant 0 : index
    %33 = vector.load %arg9[%c0_21, %c0_22] : memref<1x128xf32, #tpu.memory_space<vmem>>, vector<1x128xf32>
    %34 = vector.broadcast %33 : vector<1x128xf32> to vector<2x128xf32>
    %35 = arith.addf %32, %34 : vector<2x128xf32>
    %c0_23 = arith.constant 0 : index
    %c0_24 = arith.constant 0 : index
    %36 = vector.load %arg10[%c0_23, %c0_24] : memref<2x128xf32, #tpu.memory_space<vmem>>, vector<2x128xf32>
    tpu.vector_store %arg10[%c0_23, %c0_24], %35 {strides = array<i32>} : memref<2x128xf32, #tpu.memory_space<vmem>>, vector<2x128xf32>,
    return
  }
  func.func @transform_0(%arg0: i32) -> (i32, i32) {
    %c0_i32 = arith.constant 0 : i32
    %c0_i32_0 = arith.constant 0 : i32
    return %arg0, %c0_i32 : i32, i32
  }
  func.func @transform_1(%arg0: i32) -> (i32, i32) {
    %c0_i32 = arith.constant 0 : i32
    %c0_i32_0 = arith.constant 0 : i32
    %c0_i32_1 = arith.constant 0 : i32
    return %c0_i32, %c0_i32_0 : i32, i32
  }
  func.func @transform_2(%arg0: i32) -> (i32, i32) {
    %c0_i32 = arith.constant 0 : i32
    %c0_i32_0 = arith.constant 0 : i32
    %c0_i32_1 = arith.constant 0 : i32
    return %c0_i32, %c0_i32_0 : i32, i32
  }
  func.func @transform_3(%arg0: i32) -> (i32, i32) {
    %c0_i32 = arith.constant 0 : i32
    %c0_i32_0 = arith.constant 0 : i32
    %c0_i32_1 = arith.constant 0 : i32
    return %c0_i32, %c0_i32_0 : i32, i32
  }
  func.func @transform_4(%arg0: i32) -> (i32, i32) {
    %c0_i32 = arith.constant 0 : i32
    %c0_i32_0 = arith.constant 0 : i32
    %c0_i32_1 = arith.constant 0 : i32
    return %c0_i32, %c0_i32_0 : i32, i32
  }
  func.func @transform_5(%arg0: i32) -> (i32, i32) {
    %c0_i32 = arith.constant 0 : i32
    %c0_i32_0 = arith.constant 0 : i32
    %c0_i32_1 = arith.constant 0 : i32
    return %c0_i32, %c0_i32_0 : i32, i32
  }
  func.func @transform_6(%arg0: i32) -> (i32, i32) {
    %c0_i32 = arith.constant 0 : i32
    %c0_i32_0 = arith.constant 0 : i32
    %c0_i32_1 = arith.constant 0 : i32
    return %c0_i32, %c0_i32_0 : i32, i32
  }
  func.func @transform_7(%arg0: i32) -> (i32, i32) {
    %c0_i32 = arith.constant 0 : i32
    %c0_i32_0 = arith.constant 0 : i32
    %c0_i32_1 = arith.constant 0 : i32
    return %c0_i32, %c0_i32_0 : i32, i32
  }
  func.func @transform_8(%arg0: i32) -> (i32, i32) {
    %c0_i32 = arith.constant 0 : i32
    %c0_i32_0 = arith.constant 0 : i32
    %c0_i32_1 = arith.constant 0 : i32
    return %c0_i32, %c0_i32_0 : i32, i32
  }
  func.func @transform_9(%arg0: i32) -> (i32, i32) {
    %c0_i32 = arith.constant 0 : i32
    %c0_i32_0 = arith.constant 0 : i32
    return %arg0, %c0_i32 : i32, i32
  }
}

</mosaic_0001>

<bundles_post_ra>
// kernel: tpu_custom_call.1
= control target key start
LH: loop header
LB: loop body
LE: loop exit
PB: predicated region body
PF: predicated region fallthrough
CT: control target
= control target key end

     0   :  { %v676_v3 = vmov 0.0|0.0   ;;  %vm677_vm0 = vmmov 0   ;;  %v678_v6 = vmov 0.0   ;;  %s911_s0 = inlined_call_operand.vmem [shape: f32[2,128], index: 0, kind: input, shape index: {}]   ;;  %s912_s1 = inlined_call_operand.vmem [shape: f32[128,80], index: 1, kind: input, shape index: {}]   ;;  %s913_s2 = inlined_call_operand.vmem [shape: f32[1,80], index: 2, kind: input, shape index: {}]   ;;  %s914_s3 = inlined_call_operand.vmem [shape: f32[80,40], index: 3, kind: input, shape index: {}]   ;;  %s915_s4 = inlined_call_operand.vmem [shape: f32[1,40], index: 4, kind: input, shape index: {}]   ;;  %s916_s5 = inlined_call_operand.vmem [shape: f32[40,80], index: 5, kind: input, shape index: {}]   ;;  %s917_s6 = inlined_call_operand.vmem [shape: f32[1,80], index: 6, kind: input, shape index: {}]   ;;  %s918_s7 = inlined_call_operand.vmem [shape: f32[80,128], index: 7, kind: input, shape index: {}]   ;;  %s919_s8 = inlined_call_operand.vmem [shape: f32[1,128], index: 8, kind: input, shape index: {}]   ;;  %s920_s9 = inlined_call_operand.hbm [shape: f32[2,128], index: 9, kind: output, shape index: {}]  }
   0x1   :  { %v34_v0 = vld [vmem:[%s912_s1] sm:$0xff]  ;;  %v35_v1 = vld [vmem:[%s912_s1 + $0x8] sm:$0xff]  ;;  %v36_v2 = vld [vmem:[%s912_s1 + $0x10] sm:$0xff]  ;;  %576 = vmatprep.subr.bf16.mxu0 %v676_v3  ;;  %514 = vmatprep.mubr.msk.f32.mxu0 %vm677_vm0, %v678_v6 }
   0x2   :  { %v577_v4 = vpack.c.bf16 %v35_v1, %v34_v0  ;;  %v37_v5 = vld [vmem:[%s912_s1 + $0x18] sm:$0xff]  ;;  %600 = vmatprep.subr.bf16.mxu1 %v676_v3  ;;  %537 = vmatprep.mubr.msk.f32.mxu1 %vm677_vm0, %v678_v6  ;;  %v38_v8 = vld [vmem:[%s912_s1 + $0x20] sm:$0xff]  ;;  %v39_v9 = vld [vmem:[%s912_s1 + $0x28] sm:$0xff] }
   0x3   :  { %v580_v7 = vpack.c.bf16 %v37_v5, %v36_v2 }
   0x4   :  { %578 = vmatpush3.bf16.msra.mxu0 %v577_v4 }
   0x5   :  { %579 = vmatprep.subr.bf16.mxu0 %v676_v3 }
   0x6   :  { %14 = vsyncpa [#allocation3], 0  ;;  %v583_v10 = vpack.c.bf16 %v39_v9, %v38_v8  ;;  %v40_v11 = vld [vmem:[%s912_s1 + $0x30] sm:$0xff]  ;;  %v41_v12 = vld [vmem:[%s912_s1 + $0x38] sm:$0xff]  ;;  %vm150_vm1 = vcmask 654336   ;;  %vm242_vm2 = vcmask 326656  }
   0x7   :  { %v586_v13 = vpack.c.bf16 %v41_v12, %v40_v11  ;;  %v42_v14 = vld [vmem:[%s912_s1 + $0x40] sm:$0xff]  ;;  %v43_v15 = vld [vmem:[%s912_s1 + $0x48] sm:$0xff]  ;;  %v44_v17 = vld [vmem:[%s912_s1 + $0x50] sm:$0xff] }
   0x8   :  { %581 = vmatpush3.bf16.msra.mxu0 %v580_v7  ;;  %v589_v16 = vpack.c.bf16 %v43_v15, %v42_v14  ;;  %v45_v18 = vld [vmem:[%s912_s1 + $0x58] sm:$0xff]  ;;  %v46_v20 = vld [vmem:[%s912_s1 + $0x60] sm:$0xff]  ;;  %v47_v21 = vld [vmem:[%s912_s1 + $0x68] sm:$0xff] }
   0x9   :  { %582 = vmatprep.subr.bf16.mxu0 %v676_v3  ;;  %v592_v19 = vpack.c.bf16 %v45_v18, %v44_v17  ;;  %v595_v22 = vpack.c.bf16 %v47_v21, %v46_v20  ;;  %v48_v23 = vld [vmem:[%s912_s1 + $0x70] sm:$0xff]  ;;  %v49_v24 = vld [vmem:[%s912_s1 + $0x78] sm:$0xff]  ;;  %v33_v26 = vld [vmem:[%s911_s0] sm:$0x3]  ;;  %s679_s0 = smov [#allocation2]  }
   0xa   :  { %v598_v25 = vpack.c.bf16 %v49_v24, %v48_v23  ;;  %v133_v27 = vld [vmem:[%s914_s3] sm:$0xff]  ;;  %v134_v28 = vld [vmem:[%s914_s3 + $0x8] sm:$0xff]  ;;  %v135_v30 = vld [vmem:[%s914_s3 + $0x10] sm:$0xff]  ;;  %s419_s26 = sshll.u32 %s679_s0, 4  ;;  %s420_s26 = int_to_ptr.vmem [resolvable:$true] %s419_s26 }
   0xb   :  { %v601_v29 = vpack.c.bf16 %v134_v28, %v133_v27  ;;  %v136_v31 = vld [vmem:[%s914_s3 + $0x18] sm:$0xff]  ;;  %v137_v33 = vld [vmem:[%s914_s3 + $0x20] sm:$0xff]  ;;  %v138_v34 = vld [vmem:[%s914_s3 + $0x28] sm:$0xff]  ;;  %p657_p1 = scmp.lt.s32.totalorder %s420_s26, %s420_s26 }
   0xc   :  { %584 = vmatpush3.bf16.msra.mxu0 %v583_v10  ;;  %v604_v32 = vpack.c.bf16 %v136_v31, %v135_v30  ;;  %v607_v35 = vpack.c.bf16 %v138_v34, %v137_v33  ;;  %v139_v36 = vld [vmem:[%s914_s3 + $0x30] sm:$0xff]  ;;  %v140_v37 = vld [vmem:[%s914_s3 + $0x38] sm:$0xff]  ;;  %v141_v39 = vld [vmem:[%s914_s3 + $0x40] sm:$0xff] }
   0xd   :  { %585 = vmatprep.subr.bf16.mxu0 %v676_v3  ;;  %602 = vmatpush3.bf16.msra.mxu1 %v601_v29  ;;  %v610_v38 = vpack.c.bf16 %v140_v37, %v139_v36  ;;  %v142_v40 = vld [vmem:[%s914_s3 + $0x48] sm:$0xff]  ;;  %v427_v42 = vld [vmem:[%s913_s2] ss:$0 sm:$0xff]  ;;  %v232_v53 = vld [vmem:[%s916_s5 + $0x10] sm:$0xff] }
   0xe   :  { %603 = vmatprep.subr.bf16.mxu1 %v676_v3  ;;  %v613_v41 = vpack.c.bf16 %v142_v40, %v141_v39  ;;  %v230_v50 = vld [vmem:[%s916_s5] sm:$0xff]  ;;  %v231_v51 = vld [vmem:[%s916_s5 + $0x8] sm:$0xff]  ;;  %v233_v54 = vld [vmem:[%s916_s5 + $0x18] sm:$0xff] }
   0xf   :  { %v616_v52 = vpack.c.bf16 %v231_v51, %v230_v50  ;;  %v619_v55 = vpack.c.bf16 %v233_v54, %v232_v53  ;;  %v234_v56 = vld [vmem:[%s916_s5 + $0x20] sm:$0xff]  ;;  %v323_v2 = vld [vmem:[%s918_s7 + $0x8] sm:$0xff]  ;;  %v324_v5 = vld [vmem:[%s918_s7 + $0x10] sm:$0xff] }
  0x10   :  { %587 = vmatpush3.bf16.msra.mxu0 %v586_v13  ;;  %v429_v57 = vld [vmem:[%s915_s4] ss:$0 sm:$0xff]  ;;  %v327_v9 = vld [vmem:[%s918_s7 + $0x28] sm:$0xff]  ;;  %v328_v11 = vld [vmem:[%s918_s7 + $0x30] sm:$0xff] }
  0x11   :  { %588 = vmatprep.subr.bf16.mxu0 %v676_v3  ;;  %605 = vmatpush3.bf16.msra.mxu1 %v604_v32  ;;  %v322_v1 = vld [vmem:[%s918_s7] sm:$0xff]  ;;  %v329_v12 = vld [vmem:[%s918_s7 + $0x38] sm:$0xff]  ;;  %v331_v15 = vld [vmem:[%s918_s7 + $0x48] sm:$0xff] }
  0x12   :  { %606 = vmatprep.subr.bf16.mxu1 %v676_v3  ;;  %v622_v4 = vpack.c.bf16 %v323_v2, %v322_v1  ;;  %v326_v8 = vld [vmem:[%s918_s7 + $0x20] sm:$0xff]  ;;  %v631_v13 = vpack.c.bf16 %v329_v12, %v328_v11 }
  0x13   :  { %v628_v10 = vpack.c.bf16 %v327_v9, %v326_v8  ;;  %v330_v14 = vld [vmem:[%s918_s7 + $0x40] sm:$0xff] }
  0x14   :  { %590 = vmatpush3.bf16.msra.mxu0 %v589_v16  ;;  %v634_v16 = vpack.c.bf16 %v331_v15, %v330_v14  ;;  %v432_v17 = vld [vmem:[%s917_s6] ss:$0 sm:$0xff]  ;;  %s652_s6 = scalar_lea.vmem %s420_s26, 32 }
  0x15   :  { %591 = vmatprep.subr.bf16.mxu0 %v676_v3  ;;  %608 = vmatpush3.bf16.msra.mxu1 %v607_v35  ;;  %p653_p0 = scmp.ne.s32.totalorder %s420_s26, %s652_s6  ;;  %p658_p2 = scmp.lt.s32.totalorder %s652_s6, %s652_s6 }
  0x16   :  { %609 = vmatprep.subr.bf16.mxu1 %v676_v3 }
  0x17   :  { %p659_p3 = por %p658_p2, %p657_p1 }
  0x18   :  { %593 = vmatpush3.bf16.msra.mxu0 %v592_v19 }
  0x19   :  { %594 = vmatprep.subr.bf16.mxu0 %v676_v3  ;;  %611 = vmatpush3.bf16.msra.mxu1 %v610_v38  ;;  %p660_p4 = pnand %p659_p3, %p653_p0 }
  0x1a   :  { %612 = vmatprep.subr.bf16.mxu1 %v676_v3 }
  0x1c   :  { %596 = vmatpush3.bf16.msra.mxu0 %v595_v22 }
  0x1d   :  { %597 = vmatprep.subr.bf16.mxu0 %v676_v3  ;;  %614 = vmatpush3.bf16.msra.mxu1 %v613_v41 }
  0x1e   :  { %621 = vmatprep.subr.bf16.mxu1 %v676_v3 }
  0x20   :  { %599 = vmatpush3.bf16.msra.mxu0 %v598_v25 }
  0x21   :  { %615 = vmatprep.subr.bf16.mxu0 %v676_v3 }
  0x23   :  { %515 = vmatmul.mubr.f32.vlgmr.msra.gmra.mrb[0].mxu0 %v33_v26 }
  0x24   :  { %550 = vmatprep.mubr.msk.f32.mxu0 %vm677_vm0, %v678_v6  ;;  %617 = vmatpush3.bf16.msra.mxu0 %v616_v52 }
  0x25   :  { %618 = vmatprep.subr.bf16.mxu0 %v676_v3 }
  0x28   :  { %620 = vmatpush3.bf16.msra.mxu0 %v619_v55 }
  0x29   :  { %548 = vmatprep.subr.mxu0 %v678_v6 }
  0x2c   :  { %549 = vmatpush3.msra.mxu0 %v234_v56 }
  0xf6   :  { %v123_v43 = vpop.f32.mrb[0].mxu0 }
  0xf7   :  { %v124_v44 = vadd.f32 %v427_v42, %v123_v43  ;;  %v516_v45 = vpop.f32.mrb[1].mxu0 }
  0xf9   :  { %v428_v46 = vmul.f32 -1.442695, %v124_v44 }
  0xfb   :  { %640 = vpow2.f32 %v428_v46 }
 0x105   :  { %v641_v47 = vpop.eup %640 }
 0x106   :  { %v130_v48 = vadd.f32 1.0, %v641_v47 }
 0x108   :  { %642 = vrcp.f32 %v130_v48 }
 0x112   :  { %v643_v49 = vpop.eup %642 }
 0x113   :  { %538 = vmatmul.mubr.msk.f32.vlgmr.msra.gmra.mrb[0].mxu1 %vm150_vm1, %v643_v49 }
 0x114   :  { %573 = vmatprep.mubr.msk.f32.mxu1 %vm677_vm0, %v678_v6  ;;  %623 = vmatpush3.bf16.msra.mxu1 %v622_v4  ;;  %v325_v6 = vld [vmem:[%s918_s7 + $0x18] sm:$0xff] }
 0x115   :  { %624 = vmatprep.subr.bf16.mxu1 %v676_v3  ;;  %v625_v7 = vpack.c.bf16 %v325_v6, %v324_v5 }
 0x118   :  { %626 = vmatpush3.bf16.msra.mxu1 %v625_v7 }
 0x119   :  { %627 = vmatprep.subr.bf16.mxu1 %v676_v3 }
 0x11c   :  { %629 = vmatpush3.bf16.msra.mxu1 %v628_v10 }
 0x11d   :  { %630 = vmatprep.subr.bf16.mxu1 %v676_v3 }
 0x120   :  { %632 = vmatpush3.bf16.msra.mxu1 %v631_v13 }
 0x121   :  { %633 = vmatprep.subr.bf16.mxu1 %v676_v3  ;;  %v435_v3 = vld [vmem:[%s919_s8] ss:$0 sm:$0xff] }
 0x124   :  { %635 = vmatpush3.bf16.msra.mxu1 %v634_v16 }
 0x1e6   :  { %v220_v58 = vpop.f32.mrb[0].mxu1 }
 0x1e7   :  { %v221_v59 = vadd.f32 %v429_v57, %v220_v58  ;;  %v539_v60 = vpop.f32.mrb[1].mxu1 }
 0x1e9   :  { %v431_v61 = vmul.f32 -1.442695, %v221_v59 }
 0x1eb   :  { %644 = vpow2.f32 %v431_v61 }
 0x1f5   :  { %v645_v62 = vpop.eup %644 }
 0x1f6   :  { %v227_v63 = vadd.f32 1.0, %v645_v62 }
 0x1f8   :  { %646 = vrcp.f32 %v227_v63 }
 0x202   :  { %v647_v0 = vpop.eup %646 }
 0x203   :  { %551 = vmatmul.mubr.msk.f32.vlgmr.msra.gmra.mrb[2].mxu0 %vm242_vm2, %v647_v0 }
 0x2d6   :  { %v312_v18 = vpop.f32.mrb[2].mxu0 }
 0x2d7   :  { %v313_v19 = vadd.f32 %v432_v17, %v312_v18  ;;  %v552_v20 = vpop.f32.mrb[3].mxu0 }
 0x2d9   :  { %v434_v21 = vmul.f32 -1.442695, %v313_v19 }
 0x2db   :  { %648 = vpow2.f32 %v434_v21 }
 0x2e5   :  { %v649_v22 = vpop.eup %648 }
 0x2e6   :  { %v319_v23 = vadd.f32 1.0, %v649_v22 }
 0x2e8   :  { %650 = vrcp.f32 %v319_v23 }
 0x2f2   :  { %v651_v24 = vpop.eup %650 }
 0x2f3   :  { %574 = vmatmul.mubr.msk.f32.vlgmr.msra.gmra.mrb[2].mxu1 %vm150_vm1, %v651_v24 }
 0x3c6   :  { %v408_v25 = vpop.f32.mrb[2].mxu1 }
 0x3c7   :  { %v409_v26 = vadd.f32 %v435_v3, %v408_v25  ;;  %v575_v27 = vpop.f32.mrb[3].mxu1 }
 0x3c9   :  { %412 = vst [vmem:[#allocation2] sm:$0x3] %v409_v26 }
 0x3ca   :  { %663 = shalt.err (!%p660_p4)
}
 0x3cb   :  { %s664_s29 = scalar_lea.hbm %s920_s9, 32 }
 0x3cc   :  { %p665_p5 = scmp.ne.s32.totalorder %s920_s9, %s664_s29  ;;  %p668_p6 = scmp.lt.u32.totalorder %s664_s29, %s920_s9 }
 0x3ce   :  { %p670_p7 = pnand %p668_p6, %p665_p5 }
 0x3d0   :  { %673 = shalt.err (!%p670_p7)
}
 0x3d1   :  { %422 = dma.vmem_to_hbm [thread:$0]  %s420_s26, 32, %s920_s9, [#allocation3]  }
 0x3d2   :  { %674 = dma.done.wait [#allocation3], 32  }
 0x3d3   :  { %675 = vsyncadd [#allocation3], 4294967264 }
 0x3d4   :  { %426 = vsyncpa [#allocation3], 1 }

</bundles_post_ra>
